<compile_context>
chip_gen: v7x
topology: tpu7x:2x2x1
jax: 0.10.0
libtpu: 0.0.40
codegen_flags: <defaults>
</compile_context>

<pallas_src>
import jax
import jax.numpy as jnp
from jax import lax
from jax.experimental import pallas as pl
from jax.experimental.pallas import tpu as pltpu

_SUBLANE = 8


def _round_up(n, m):
    return pl.cdiv(n, m) * m


def _residual_ff_kernel(x_ref, g_ref, beta_ref, w1_ref, b1_ref, w2_ref, b2_ref,
                        o_ref):
    # x_ref: (TR, D) row tile in the input's native dtype; math in f32.
    x = x_ref[...].astype(jnp.float32)
    res = x

    # --- LayerNorm over the embedding dim (torch.nn.LayerNorm, eps=1e-5) ----
    mu = jnp.mean(x, axis=-1, keepdims=True)
    xc = x - mu
    var = jnp.mean(xc * xc, axis=-1, keepdims=True)
    xn = xc * lax.rsqrt(var + 1e-5)
    xn = xn * g_ref[...] + beta_ref[...]

    # --- FeedForward: Linear -> GELU(erf) -> Linear (f32 operands, f32 acc) --
    h = jnp.dot(xn, w1_ref[...], preferred_element_type=jnp.float32) + b1_ref[...]
    h = 0.5 * h * (1.0 + lax.erf(h * jnp.float32(0.7071067811865476)))
    y = jnp.dot(h, w2_ref[...], preferred_element_type=jnp.float32) + b2_ref[...]

    # --- ResidualAdd: fn(x) + x ----------------------------------------------
    o_ref[...] = (y + res).astype(o_ref.dtype)


def residual_add_ff(x, gamma, beta, w1, b1, w2, b2, *, tile_rows=1024,
                    min_grid_steps=2):
    """x: (B, S, D).  Returns fn(x) + x with fn = LayerNorm -> Linear -> GELU -> Linear."""
    B, S, D = x.shape
    H = w1.shape[1]
    rows = B * S

    # Row tile: large enough to amortize the ~0.35us per-grid-step overhead,
    # but capped so the row grid has >= min_grid_steps steps (v7x megacore).
    tr = min(tile_rows, _round_up(pl.cdiv(rows, min_grid_steps), _SUBLANE))
    tr = max(tr, _SUBLANE)
    rows_p = _round_up(rows, tr)

    # Activations stay in their native dtype and unpadded feature dim; only the
    # row count is padded (when needed) up to a tile multiple with zeros.
    x2 = x.reshape(rows, D)
    if rows_p != rows:
        x2 = jnp.pad(x2, ((0, rows_p - rows), (0, 0)))

    f32 = jnp.float32
    gamma2 = gamma.reshape(1, D).astype(f32)
    beta2 = beta.reshape(1, D).astype(f32)
    w1f = w1.astype(f32)
    w2f = w2.astype(f32)
    b1f = b1.reshape(1, H).astype(f32)
    b2f = b2.reshape(1, D).astype(f32)

    grid = (rows_p // tr,)
    out = pl.pallas_call(
        _residual_ff_kernel,
        out_shape=jax.ShapeDtypeStruct((rows_p, D), x.dtype),
        grid_spec=pltpu.PrefetchScalarGridSpec(
            num_scalar_prefetch=0,
            grid=grid,
            in_specs=[
                pl.BlockSpec((tr, D), lambda i: (i, 0)),   # x row tile
                pl.BlockSpec((1, D), lambda i: (0, 0)),    # gamma
                pl.BlockSpec((1, D), lambda i: (0, 0)),    # beta
                pl.BlockSpec((D, H), lambda i: (0, 0)),    # W1
                pl.BlockSpec((1, H), lambda i: (0, 0)),    # b1
                pl.BlockSpec((H, D), lambda i: (0, 0)),    # W2
                pl.BlockSpec((1, D), lambda i: (0, 0)),    # b2
            ],
            out_specs=pl.BlockSpec((tr, D), lambda i: (i, 0)),
        ),
        compiler_params=pltpu.CompilerParams(
            dimension_semantics=("parallel",),   # row grid shards across TCs on v7x
            vmem_limit_bytes=32 * 1024 * 1024,   # per-step working set is a few MiB
        ),
    )(x2, gamma2, beta2, w1f, b1f, w2f, b2f)

    if rows_p != rows:
        out = out[:rows]
    return out.reshape(B, S, D)


def _reference(x, gamma, beta, w1, b1, w2, b2):
    # Plain-JAX mirror of the PyTorch module (LayerNorm -> Linear -> GELU -> Linear) + x.
    xf = x.astype(jnp.float32)
    mu = jnp.mean(xf, axis=-1, keepdims=True)
    var = jnp.mean((xf - mu) ** 2, axis=-1, keepdims=True)
    xn = (xf - mu) * lax.rsqrt(var + 1e-5) * gamma.reshape(1, 1, -1) + beta.reshape(1, 1, -1)
    h = jnp.dot(xn, w1.astype(jnp.float32),
                preferred_element_type=jnp.float32) + b1.reshape(1, 1, -1)
    h = 0.5 * h * (1.0 + lax.erf(h / jnp.sqrt(2.0)))
    y = jnp.dot(h, w2.astype(jnp.float32),
                preferred_element_type=jnp.float32) + b2.reshape(1, 1, -1)
    return (y + xf).astype(x.dtype)


if __name__ == "__main__":
    key = jax.random.PRNGKey(0)
    B, S, D = 2, 8, 32          # batch, tokens, embedding
    EXP = 4
    H = EXP * D                 # feed-forward expansion -> 128

    ks = jax.random.split(key, 5)
    x = jax.random.normal(ks[0], (B, S, D), dtype=jnp.float32)
    gamma = jnp.ones((D,), jnp.float32)
    beta = jnp.zeros((D,), jnp.float32)
    w1 = jax.random.normal(ks[1], (D, H), jnp.float32) * (1.0 / jnp.sqrt(D))
    b1 = jax.random.normal(ks[2], (H,), jnp.float32) * 0.01
    w2 = jax.random.normal(ks[3], (H, D), jnp.float32) * (1.0 / jnp.sqrt(H))
    b2 = jax.random.normal(ks[4], (D,), jnp.float32) * 0.01

    out = residual_add_ff(x, gamma, beta, w1, b1, w2, b2)
    out = jax.block_until_ready(out)

    ref = _reference(x, gamma, beta, w1, b1, w2, b2)
    assert out.shape == x.shape and out.dtype == x.dtype
    # Tolerance covers MXU f32-matmul pass differences vs the XLA reference.
    assert jnp.allclose(out, ref, atol=2e-2, rtol=2e-2), "mismatch vs reference"

    print("KERNEL_OK")
</pallas_src>

<mosaic_0001>
module attributes {stable_mosaic.version = 11 : i64} {
  func.func @_residual_ff_kernel(%arg0: i32, %arg1: memref<8x32xf32, #tpu.memory_space<vmem>>, %arg2: memref<1x32xf32, #tpu.memory_space<vmem>>, %arg3: memref<1x32xf32, #tpu.memory_space<vmem>>, %arg4: memref<32x128xf32, #tpu.memory_space<vmem>>, %arg5: memref<1x128xf32, #tpu.memory_space<vmem>>, %arg6: memref<128x32xf32, #tpu.memory_space<vmem>>, %arg7: memref<1x32xf32, #tpu.memory_space<vmem>>, %arg8: memref<8x32xf32, #tpu.memory_space<vmem>>) attributes {dimension_semantics = [#tpu.dimension_semantics<parallel>], iteration_bounds = array<i64: 2>, scalar_prefetch = 0 : i64, scratch_operands = 0 : i64, tpu.core_type = #tpu.core_type<tc>, window_params = [{transform_indices = @transform_0, window_bounds = array<i64: 8, 32>}, {pipeline_mode = #tpu.pipeline_mode<synchronous>, transform_indices = @transform_1, window_bounds = array<i64: 1, 32>}, {pipeline_mode = #tpu.pipeline_mode<synchronous>, transform_indices = @transform_2, window_bounds = array<i64: 1, 32>}, {pipeline_mode = #tpu.pipeline_mode<synchronous>, transform_indices = @transform_3, window_bounds = array<i64: 32, 128>}, {pipeline_mode = #tpu.pipeline_mode<synchronous>, transform_indices = @transform_4, window_bounds = array<i64: 1, 128>}, {pipeline_mode = #tpu.pipeline_mode<synchronous>, transform_indices = @transform_5, window_bounds = array<i64: 128, 32>}, {pipeline_mode = #tpu.pipeline_mode<synchronous>, transform_indices = @transform_6, window_bounds = array<i64: 1, 32>}, {transform_indices = @transform_7, window_bounds = array<i64: 8, 32>}]} {
    %c0 = arith.constant 0 : index
    %c0_0 = arith.constant 0 : index
    %0 = vector.load %arg1[%c0, %c0_0] : memref<8x32xf32, #tpu.memory_space<vmem>>, vector<8x32xf32>
    %cst = arith.constant dense<0.000000e+00> : vector<8xf32>
    %1 = vector.multi_reduction <add>, %0, %cst [1] : vector<8x32xf32> to vector<8xf32>
    %2 = vector.shape_cast %1 : vector<8xf32> to vector<8x1xf32>
    %cst_1 = arith.constant 3.200000e+01 : f32
    %3 = vector.broadcast %cst_1 : f32 to vector<8x1xf32>
    %4 = arith.divf %2, %3 : vector<8x1xf32>
    %5 = vector.broadcast %4 : vector<8x1xf32> to vector<8x32xf32>
    %6 = arith.subf %0, %5 : vector<8x32xf32>
    %7 = arith.mulf %6, %6 : vector<8x32xf32>
    %cst_2 = arith.constant dense<0.000000e+00> : vector<8xf32>
    %8 = vector.multi_reduction <add>, %7, %cst_2 [1] : vector<8x32xf32> to vector<8xf32>
    %9 = vector.shape_cast %8 : vector<8xf32> to vector<8x1xf32>
    %cst_3 = arith.constant 3.200000e+01 : f32
    %10 = vector.broadcast %cst_3 : f32 to vector<8x1xf32>
    %11 = arith.divf %9, %10 : vector<8x1xf32>
    %cst_4 = arith.constant 9.99999974E-6 : f32
    %12 = vector.broadcast %cst_4 : f32 to vector<8x1xf32>
    %13 = arith.addf %11, %12 : vector<8x1xf32>
    %14 = math.rsqrt %13 : vector<8x1xf32>
    %15 = vector.broadcast %14 : vector<8x1xf32> to vector<8x32xf32>
    %16 = arith.mulf %6, %15 : vector<8x32xf32>
    %c0_5 = arith.constant 0 : index
    %c0_6 = arith.constant 0 : index
    %17 = vector.load %arg2[%c0_5, %c0_6] : memref<1x32xf32, #tpu.memory_space<vmem>>, vector<1x32xf32>
    %18 = vector.broadcast %17 : vector<1x32xf32> to vector<8x32xf32>
    %19 = arith.mulf %16, %18 : vector<8x32xf32>
    %c0_7 = arith.constant 0 : index
    %c0_8 = arith.constant 0 : index
    %20 = vector.load %arg3[%c0_7, %c0_8] : memref<1x32xf32, #tpu.memory_space<vmem>>, vector<1x32xf32>
    %21 = vector.broadcast %20 : vector<1x32xf32> to vector<8x32xf32>
    %22 = arith.addf %19, %21 : vector<8x32xf32>
    %c0_9 = arith.constant 0 : index
    %c0_10 = arith.constant 0 : index
    %23 = vector.load %arg4[%c0_9, %c0_10] : memref<32x128xf32, #tpu.memory_space<vmem>>, vector<32x128xf32>
    %cst_11 = arith.constant dense<0.000000e+00> : vector<8x128xf32>
    %24 = tpu.matmul %22, %23, %cst_11 {dimension_numbers = #tpu.dot_dimension_numbers<[1], [0], [0], [1], [0, 0, 1, 1], [], []>} : vector<8x32xf32>, vector<32x128xf32>, vector<8x128xf32> -> vector<8x128xf32>
    %c0_12 = arith.constant 0 : index
    %c0_13 = arith.constant 0 : index
    %25 = vector.load %arg5[%c0_12, %c0_13] : memref<1x128xf32, #tpu.memory_space<vmem>>, vector<1x128xf32>
    %26 = vector.broadcast %25 : vector<1x128xf32> to vector<8x128xf32>
    %27 = arith.addf %24, %26 : vector<8x128xf32>
    %cst_14 = arith.constant 5.000000e-01 : f32
    %28 = vector.broadcast %cst_14 : f32 to vector<8x128xf32>
    %29 = arith.mulf %28, %27 : vector<8x128xf32>
    %cst_15 = arith.constant 0.707106769 : f32
    %30 = vector.broadcast %cst_15 : f32 to vector<8x128xf32>
    %31 = arith.mulf %27, %30 : vector<8x128xf32>
    %32 = math.erf %31 : vector<8x128xf32>
    %cst_16 = arith.constant 1.000000e+00 : f32
    %33 = vector.broadcast %cst_16 : f32 to vector<8x128xf32>
    %34 = arith.addf %33, %32 : vector<8x128xf32>
    %35 = arith.mulf %29, %34 : vector<8x128xf32>
    %c0_17 = arith.constant 0 : index
    %c0_18 = arith.constant 0 : index
    %36 = vector.load %arg6[%c0_17, %c0_18] : memref<128x32xf32, #tpu.memory_space<vmem>>, vector<128x32xf32>
    %cst_19 = arith.constant dense<0.000000e+00> : vector<8x32xf32>
    %37 = tpu.matmul %35, %36, %cst_19 {dimension_numbers = #tpu.dot_dimension_numbers<[1], [0], [0], [1], [0, 0, 1, 1], [], []>} : vector<8x128xf32>, vector<128x32xf32>, vector<8x32xf32> -> vector<8x32xf32>
    %c0_20 = arith.constant 0 : index
    %c0_21 = arith.constant 0 : index
    %38 = vector.load %arg7[%c0_20, %c0_21] : memref<1x32xf32, #tpu.memory_space<vmem>>, vector<1x32xf32>
    %39 = vector.broadcast %38 : vector<1x32xf32> to vector<8x32xf32>
    %40 = arith.addf %37, %39 : vector<8x32xf32>
    %41 = arith.addf %40, %0 : vector<8x32xf32>
    %c0_22 = arith.constant 0 : index
    %c0_23 = arith.constant 0 : index
    %42 = vector.load %arg8[%c0_22, %c0_23] : memref<8x32xf32, #tpu.memory_space<vmem>>, vector<8x32xf32>
    tpu.vector_store %arg8[%c0_22, %c0_23], %41 {strides = array<i32>} : memref<8x32xf32, #tpu.memory_space<vmem>>, vector<8x32xf32>,
    return
  }
  func.func @transform_0(%arg0: i32) -> (i32, i32) {
    %c0_i32 = arith.constant 0 : i32
    %c0_i32_0 = arith.constant 0 : i32
    return %arg0, %c0_i32 : i32, i32
  }
  func.func @transform_1(%arg0: i32) -> (i32, i32) {
    %c0_i32 = arith.constant 0 : i32
    %c0_i32_0 = arith.constant 0 : i32
    %c0_i32_1 = arith.constant 0 : i32
    return %c0_i32, %c0_i32_0 : i32, i32
  }
  func.func @transform_2(%arg0: i32) -> (i32, i32) {
    %c0_i32 = arith.constant 0 : i32
    %c0_i32_0 = arith.constant 0 : i32
    %c0_i32_1 = arith.constant 0 : i32
    return %c0_i32, %c0_i32_0 : i32, i32
  }
  func.func @transform_3(%arg0: i32) -> (i32, i32) {
    %c0_i32 = arith.constant 0 : i32
    %c0_i32_0 = arith.constant 0 : i32
    %c0_i32_1 = arith.constant 0 : i32
    return %c0_i32, %c0_i32_0 : i32, i32
  }
  func.func @transform_4(%arg0: i32) -> (i32, i32) {
    %c0_i32 = arith.constant 0 : i32
    %c0_i32_0 = arith.constant 0 : i32
    %c0_i32_1 = arith.constant 0 : i32
    return %c0_i32, %c0_i32_0 : i32, i32
  }
  func.func @transform_5(%arg0: i32) -> (i32, i32) {
    %c0_i32 = arith.constant 0 : i32
    %c0_i32_0 = arith.constant 0 : i32
    %c0_i32_1 = arith.constant 0 : i32
    return %c0_i32, %c0_i32_0 : i32, i32
  }
  func.func @transform_6(%arg0: i32) -> (i32, i32) {
    %c0_i32 = arith.constant 0 : i32
    %c0_i32_0 = arith.constant 0 : i32
    %c0_i32_1 = arith.constant 0 : i32
    return %c0_i32, %c0_i32_0 : i32, i32
  }
  func.func @transform_7(%arg0: i32) -> (i32, i32) {
    %c0_i32 = arith.constant 0 : i32
    %c0_i32_0 = arith.constant 0 : i32
    return %arg0, %c0_i32 : i32, i32
  }
}

</mosaic_0001>

<bundles_post_ra>
// kernel: tpu_custom_call.1
= control target key start
LH: loop header
LB: loop body
LE: loop exit
PB: predicated region body
PF: predicated region fallthrough
CT: control target
= control target key end

     0   :  { %12 = vsyncpa [#allocation3], 0  ;;  %s1011_s0 = inlined_call_operand.vmem [shape: f32[16,32], index: 0, kind: input, shape index: {}]   ;;  %s1012_s1 = inlined_call_operand.vmem [shape: f32[1,32], index: 1, kind: input, shape index: {}]   ;;  %s1013_s2 = inlined_call_operand.vmem [shape: f32[1,32], index: 2, kind: input, shape index: {}]   ;;  %s1014_s3 = inlined_call_operand.vmem [shape: f32[32,128], index: 3, kind: input, shape index: {}]   ;;  %s1015_s4 = inlined_call_operand.vmem [shape: f32[1,128], index: 4, kind: input, shape index: {}]   ;;  %s1016_s5 = inlined_call_operand.vmem [shape: f32[128,32], index: 5, kind: input, shape index: {}]   ;;  %s1017_s6 = inlined_call_operand.vmem [shape: f32[1,32], index: 6, kind: input, shape index: {}]   ;;  %s1018_s7 = inlined_call_operand.hbm [shape: f32[16,32], index: 7, kind: output, shape index: {}]  }
   0x1   :  { %14 = vsyncpa [#allocation3 + $0x1], 0  ;;  %s830_s24 = smov 0   ;;  %s832_s25 = smov 0  }
   0x2   :  { %s834_s26 = smov 0   ;;  %s836_s27 = smov 0  }
   0x3 LB: > { %s851_s28 = sadd.s32 4294967295, %s784_s27   ;;  %s563_s29 = sadd.s32 4294967294, %s784_s27   ;;  %s784_s27 = sphi %s836_s27, %s1024_s27   ;;  %s780_s26 = sphi %s834_s26, %s1023_s26   ;;  %s776_s25 = sphi %s832_s25, %s1022_s25   ;;  %s772_s24 = sphi %s830_s24, %s1021_s24  }
   0x4   : > { %s855_s30 = sadd.s32 1, %s784_s27   ;;  %s179_s8 = sadd.s32 1, %s780_s26 }
   0x5   : > { %s176_s9 = ssub.s32 %s784_s27, %s855_s30  ;;  %p189_p0 = scmp.ne.s32.totalorder %s780_s26, %s776_s25 }
   0x6   : > { %p177_p1 = scmp.eq.s32.totalorder %s176_s9, 0  ;;  %p190_p2 = scmp.eq.s32.totalorder %s851_s28, 1 }
   0x7   : > { %p195_p3 = scmp.ne.s32.totalorder %s776_s25, %s772_s24  ;;  %p196_p4 = scmp.eq.s32.totalorder %s563_s29, 1 }
   0x8   : > { %s866_s10 = scalar_select %p177_p1, %s780_s26, %s179_s8  }
   0x9   : > { %p868_p5 = por %p190_p2, %p189_p0  ;;  %p872_p6 = por %p196_p4, %p195_p3 }
   0xa   : > { %p566_p7 = scmp.ge.s32.totalorder %s784_s27, 1  ;;  %p239_p8 = scmp.lt.s32.totalorder %s784_s27, 3 }
   0xc   : > { %p240_p9 = pnand %p566_p7, %p239_p8 }
   0xd   : > { %p270_p10 = scmp.lt.s32.totalorder (!%p240_p9), %s851_s28, 1  ;;  %vm275_vm0 = vcmask (!%p240_p9), 261120   ;;  %v306_v7 = vld [vmem:[%s1014_s3] sm:$0xff] (!%p240_p9)  ;;  %v307_v8 = vld [vmem:[%s1014_s3 + $0x8] sm:$0xff] (!%p240_p9)  ;;  %v308_v9 = vld [vmem:[%s1014_s3 + $0x10] sm:$0xff] (!%p240_p9)  ;;  %v786_v10 = vmov (!%p240_p9), 0.0|0.0  }
   0xe   : > { %243 = sbr.rel (%p240_p9) target bundleno = 800 (0x320), region = 48  ;;  %646 = vmatprep.subr.bf16.mxu0 (!%p240_p9), %v786_v10  ;;  %v647_v11 = vpack.c.bf16 (!%p240_p9), %v307_v8, %v306_v7  ;;  %v309_v12 = vld [vmem:[%s1014_s3 + $0x18] sm:$0xff] (!%p240_p9)  ;;  %vm787_vm1 = vmmov (!%p240_p9), 0   ;;  %v788_v13 = vmov (!%p240_p9), 0.0   ;;  %652 = vmatprep.subr.bf16.mxu1 (!%p240_p9), %v786_v10  ;;  %v395_v15 = vld [vmem:[%s1016_s5] sm:$0xff] (!%p240_p9)  ;;  %v396_v16 = vld [vmem:[%s1016_s5 + $0x8] sm:$0xff] (!%p240_p9) }
   0xf   : > { %608 = vmatprep.mubr.msk.f32.mxu0 (!%p240_p9), %vm787_vm1, %v788_v13  ;;  %643 = vmatprep.mubr.msk.f32.mxu1 (!%p240_p9), %vm787_vm1, %v788_v13  ;;  %v650_v14 = vpack.c.bf16 (!%p240_p9), %v309_v12, %v308_v9  ;;  %v397_v17 = vld [vmem:[%s1016_s5 + $0x10] sm:$0xff] (!%p240_p9)  ;;  %v653_v18 = vpack.c.bf16 (!%p240_p9), %v396_v16, %v395_v15  ;;  %v398_v19 = vld [vmem:[%s1016_s5 + $0x18] sm:$0xff] (!%p240_p9)  ;;  %v399_v21 = vld [vmem:[%s1016_s5 + $0x20] sm:$0xff] (!%p240_p9)  ;;  %s267_s22 = sand.u32 (!%p240_p9), 1, %s776_s25   ;;  %s575_s9 = sshll.u32 (!%p240_p9), %s851_s28, 7 }
  0x10   : > { %648 = vmatpush3.bf16.msra.mxu0 (!%p240_p9), %v647_v11  ;;  %v656_v20 = vpack.c.bf16 (!%p240_p9), %v398_v19, %v397_v17  ;;  %v400_v22 = vld [vmem:[%s1016_s5 + $0x28] sm:$0xff] (!%p240_p9)  ;;  %v569_v28 = vld [vmem:[%s1012_s1] ss:$0 sm:$0xff] (!%p240_p9)  ;;  %v401_v33 = vld [vmem:[%s1016_s5 + $0x30] sm:$0xff] (!%p240_p9)  ;;  %s567_s23 = sshll.u32 (!%p240_p9), %s267_s22, 3  ;;  %s491_s18 = scalar_lea.sflag (!%p240_p9), [#allocation3], %s267_s22 }
  0x11   : > { %649 = vmatprep.subr.bf16.mxu0 (!%p240_p9), %v786_v10  ;;  %654 = vmatpush3.bf16.msra.mxu1 (!%p240_p9), %v653_v18  ;;  %v659_v23 = vpack.c.bf16 (!%p240_p9), %v400_v22, %v399_v21  ;;  %v570_v30 = vld [vmem:[%s1013_s2] ss:$0 sm:$0xff] (!%p240_p9)  ;;  %v402_v34 = vld [vmem:[%s1016_s5 + $0x38] sm:$0xff] (!%p240_p9)  ;;  %v404_v37 = vld [vmem:[%s1016_s5 + $0x48] sm:$0xff] (!%p240_p9)  ;;  %s789_s19 = smov (!%p240_p9), [#allocation2]  }
  0x12   : > { %655 = vmatprep.subr.bf16.mxu1 (!%p240_p9), %v786_v10  ;;  %v662_v35 = vpack.c.bf16 (!%p240_p9), %v402_v34, %v401_v33  ;;  %v403_v36 = vld [vmem:[%s1016_s5 + $0x40] sm:$0xff] (!%p240_p9)  ;;  %v405_v39 = vld [vmem:[%s1016_s5 + $0x50] sm:$0xff] (!%p240_p9)  ;;  %v406_v40 = vld [vmem:[%s1016_s5 + $0x58] sm:$0xff] (!%p240_p9)  ;;  %s726_s20 = sshll.u32 (!%p240_p9), %s789_s19, 4  ;;  %s727_s20 = int_to_ptr.vmem [resolvable:$false] %s726_s20 }
  0x13   : > { %v665_v38 = vpack.c.bf16 (!%p240_p9), %v404_v37, %v403_v36  ;;  %v668_v41 = vpack.c.bf16 (!%p240_p9), %v406_v40, %v405_v39  ;;  %v407_v42 = vld [vmem:[%s1016_s5 + $0x60] sm:$0xff] (!%p240_p9)  ;;  %v408_v43 = vld [vmem:[%s1016_s5 + $0x68] sm:$0xff] (!%p240_p9)  ;;  %v409_v45 = vld [vmem:[%s1016_s5 + $0x70] sm:$0xff] (!%p240_p9)  ;;  %s728_s21 = scalar_lea.vmem (!%p240_p9), %s727_s20, 256 }
  0x14   : > { %651 = vmatpush3.bf16.msra.mxu0 (!%p240_p9), %v650_v14  ;;  %v671_v44 = vpack.c.bf16 (!%p240_p9), %v408_v43, %v407_v42  ;;  %v410_v46 = vld [vmem:[%s1016_s5 + $0x78] sm:$0xff] (!%p240_p9)  ;;  %v571_v48 = vld [vmem:[%s1015_s4] ss:$0 sm:$0xff] (!%p240_p9) }
  0x15   : > { %s271_s13 = scalar_select %p270_p10, %s851_s28, 1  ;;  %657 = vmatpush3.bf16.msra.mxu1 %v656_v20  ;;  %v674_v47 = vpack.c.bf16 %v410_v46, %v409_v45  ;;  %v573_v57 = vld [vmem:[%s1017_s6] ss:$0 sm:$0xff] }
  0x16   : > { %658 = vmatprep.subr.bf16.mxu1 %v786_v10 }
  0x17   : > { %s568_s14 = sshll.u32 %s271_s13, 3  ;;  %s269_s13 = scalar_lea.vmem [#allocation2], %s567_s23 }
  0x18   : > { %s273_s17 = scalar_lea.vmem %s1011_s0, %s568_s14  ;;  %s504_s14 = sshll.u32 %s269_s13, 4  ;;  %s970_s14 = int_to_ptr.vmem [resolvable:$true] %s504_s14 }
  0x19   : > { %v883_v0 = vld [vmem:[%s273_s17] sm:$0xff]  ;;  %660 = vmatpush3.bf16.msra.mxu1 %v659_v23  ;;  %s968_s17 = scalar_lea.hbm %s1018_s7, %s575_s9  ;;  %s722_s28 = scalar_lea.vmem %s970_s14, 128 }
  0x1a   : > { %v276_v1 = vsel %vm275_vm0, %v883_v0, 0.0  ;;  %661 = vmatprep.subr.bf16.mxu1 %v786_v10  ;;  %p723_p11 = scmp.ne.s32.totalorder %s970_s14, %s722_s28  ;;  %p729_p0 = scmp.lt.s32.totalorder %s970_s14, %s727_s20 }
  0x1b   : > { %277 = vadd.xlane.f32.xlu0 %v276_v1  ;;  %p730_p1 = scmp.lt.s32.totalorder %s728_s21, %s722_s28 }
  0x1c   : > { %p724_p12 = pnand %p723_p11, %p868_p5 }
  0x1d   : > { %663 = vmatpush3.bf16.msra.mxu1 %v662_v35  ;;  %p731_p2 = por %p730_p1, %p729_p0 }
  0x1e   : > { %664 = vmatprep.subr.bf16.mxu1 %v786_v10  ;;  %p725_p13 = pneg %p724_p12 }
  0x20   : > { %p732_p3 = pnand %p731_p2, %p725_p13 }
  0x21   : > { %666 = vmatpush3.bf16.msra.mxu1 %v665_v38 }
  0x22   : > { %667 = vmatprep.subr.bf16.mxu1 %v786_v10 }
  0x25   : > { %669 = vmatpush3.bf16.msra.mxu1 %v668_v41 }
  0x26   : > { %670 = vmatprep.subr.bf16.mxu1 %v786_v10 }
  0x29   : > { %672 = vmatpush3.bf16.msra.mxu1 %v671_v44 }
  0x2a   : > { %673 = vmatprep.subr.bf16.mxu1 %v786_v10 }
  0x2d   : > { %675 = vmatpush3.bf16.msra.mxu1 %v674_v47 }
  0xa8   : > { %v278_v2 = vpop.xlane.xlu0 %277 }
  0xa9   : > { %v280_v3 = vmul.f32 0.03125, %v278_v2 }
  0xab   : > { %v281_v4 = vsub.f32 %v883_v0, %v280_v3 }
  0xad   : > { %v282_v5 = vmul.f32 %v281_v4, %v281_v4 }
  0xaf   : > { %v283_v6 = vsel %vm275_vm0, %v282_v5, 0.0 }
  0xb0   : > { %284 = vadd.xlane.f32.xlu0 %v283_v6 }
 0x13d   : > { %v285_v24 = vpop.xlane.xlu0 %284 }
 0x13e   : > { %v286_v25 = vmul.f32 0.03125, %v285_v24 }
 0x140   : > { %v287_v26 = vadd.f32 1e-05, %v286_v25 }
 0x142   : > { %718 = vrsqrt.f32 %v287_v26 }
 0x14c   : > { %v719_v27 = vpop.eup %718 }
 0x14d   : > { %v289_v29 = vmul.f32 %v719_v27, %v281_v4 }
 0x14f   : > { %v297_v31 = vmul.f32 %v569_v28, %v289_v29 }
 0x151   : > { %v305_v32 = vadd.f32 %v570_v30, %v297_v31 }
 0x153   : > { %609 = vmatmul.mubr.msk.f32.vlgmr.msra.gmra.mrb[0].mxu0 %vm275_vm0, %v305_v32 }
 0x226   : > { %v386_v49 = vpop.f32.mrb[0].mxu0 }
 0x227   : > { %v387_v50 = vadd.f32 %v571_v48, %v386_v49  ;;  %v610_v51 = vpop.f32.mrb[1].mxu0 }
 0x229   : > { %v391_v52 = vmul.f32 0.70710677, %v387_v50  ;;  %v390_v54 = vmul.f32 0.5, %v387_v50 }
 0x22b   : > { %720 = verf.f32 %v391_v52 }
 0x235   : > { %v721_v53 = vpop.eup %720 }
 0x236   : > { %v393_v55 = vadd.f32 1.0, %v721_v53 }
 0x238   : > { %v394_v56 = vmul.f32 %v393_v55, %v390_v54 }
 0x23a   : > { %644 = vmatmul.mubr.f32.vlgmr.msra.gmra.mrb[0].mxu1 %v394_v56 }
 0x30d   : > { %v484_v58 = vpop.f32.mrb[0].mxu1 }
 0x30e   : > { %v485_v59 = vadd.f32 %v573_v57, %v484_v58  ;;  %v645_v60 = vpop.f32.mrb[1].mxu1 }
 0x310   : > { %v488_v61 = vadd.f32 %v485_v59, %v883_v0 }
 0x312   : > { %489 = vst.msk [vmem:[%s269_s13] sm:$0xff] %vm275_vm0, %v488_v61 }
 0x313   : > { %735 = shalt.err (!%p732_p3)
}
 0x314   : > { %s736_s22 = scalar_lea.hbm %s968_s17, 128  ;;  %s740_s8 = scalar_lea.hbm %s1018_s7, 256 }
 0x315   : > { %p737_p4 = scmp.ne.s32.totalorder %s968_s17, %s736_s22  ;;  %p741_p9 = scmp.lt.u32.totalorder %s968_s17, %s1018_s7 }
 0x316   : > { %p742_p10 = scmp.lt.u32.totalorder %s740_s8, %s736_s22  ;;  %p744_p12 = scmp.lt.u32.totalorder %s736_s22, %s968_s17 }
 0x317   : > { %p738_p7 = pnand %p737_p4, %p868_p5 }
 0x318   : > { %p743_p11 = por %p742_p10, %p741_p9 }
 0x319   : > { %p739_p8 = pneg %p738_p7 }
 0x31a   : > { %p745_p13 = por %p744_p12, %p743_p11 }
 0x31c   : > { %p746_p0 = pnand %p745_p13, %p739_p8 }
 0x31e   : > { %749 = shalt.err (!%p746_p0)
}
 0x31f   : > { %676 = dma.vmem_to_hbm [thread:$0]  (%p868_p5), %s970_s14, 128, %s968_s17, %s491_s18  }
 0x320 PF: > { %p682_p1 = scmp.ge.s32.totalorder %s784_s27, 2  ;;  %s516_s15 = sand.u32 1, %s772_s24  }
 0x321   : > { %s517_s16 = scalar_lea.sflag [#allocation3], %s516_s15 }
 0x322   : > { %p679_p2 = pnand %p682_p1, %p872_p6 }
 0x324   : > { %767 = dma.done.wait (!%p679_p2), %s517_s16, 128  }
 0x325   : > { %769 = vsyncadd (!%p679_p2), %s517_s16, 4294967168  ;;  %p17_p3 = scmp.ge.s32.totalorder %s855_s30, 4   ;;  %s1021_s24 = smov %s776_s25 }
 0x326   : > { %s1022_s25 = smov %s780_s26  ;;  %s1023_s26 = smov %s866_s10 }
 0x327   : > { %s1024_s27 = smov %s855_s30  ;;  %19 = sbr.rel (!%p17_p3) target bundleno = 3 (0x3), region = 83 }
 0x32e   :  { %522 = vsyncpa [#allocation3], 1 }
 0x32f   :  { %524 = vsyncpa [#allocation3 + $0x1], 1 }

</bundles_post_ra>
